<compile_context>
chip_gen: v7x
topology: tpu7x:2x2x1
jax: 0.10.0
libtpu: 0.0.40
codegen_flags: <defaults>
</compile_context>

<pallas_src>
import functools

import jax
import jax.numpy as jnp
from jax import lax
from jax.experimental import pallas as pl
from jax.experimental.pallas import tpu as pltpu


def _inner_product_kernel(zr_ref, zc_ref, o_ref, *, apply_act):
    """o[i, j] tile = z_rows @ z_cols^T (contraction over the feature axis)."""
    acc = lax.dot_general(
        zr_ref[...], zc_ref[...],
        dimension_numbers=(((1,), (1,)), ((), ())),   # contract last axes, no .T
        preferred_element_type=jnp.float32)
    if apply_act is not None:
        acc = apply_act(acc)
    o_ref[...] = acc.astype(o_ref.dtype)


def inner_product_decoder(z, *, act=None, tile=256, out_dtype=jnp.float32):
    """adj = act(z @ z.T).  act=None reproduces the module default (identity)."""
    n, d = z.shape

    # Lane-dense output tiles: force tile to a multiple of 128, clamp for VMEM
    # headroom (a 512x512 f32 out tile is 1 MiB; well under v7x's 64 MiB VMEM).
    tile = max(128, min(int(tile), 512))
    tile = (tile // 128) * 128
    if n <= 128:
        tile = 128
    n_pad = pl.cdiv(n, tile) * tile

    z = z.astype(jnp.float32)
    if n_pad != n:
        # Zero-padded rows produce zero rows/cols in the product; sliced off below.
        z = jnp.pad(z, ((0, n_pad - n), (0, 0)))

    grid = (n_pad // tile, n_pad // tile)
    kernel = functools.partial(_inner_product_kernel, apply_act=act)

    out = pl.pallas_call(
        kernel,
        grid_spec=pltpu.PrefetchScalarGridSpec(
            num_scalar_prefetch=0,
            grid=grid,
            # Row tile of z is constant across the inner j axis, so its DMA is
            # not re-issued; the column tile changes every step.
            in_specs=[pl.BlockSpec((tile, d), lambda i, j: (i, 0)),
                      pl.BlockSpec((tile, d), lambda i, j: (j, 0))],
            out_specs=pl.BlockSpec((tile, tile), lambda i, j: (i, j)),
        ),
        out_shape=jax.ShapeDtypeStruct((n_pad, n_pad), out_dtype),
        compiler_params=pltpu.CompilerParams(
            dimension_semantics=("parallel", "parallel")),
        cost_estimate=pl.CostEstimate(
            flops=2 * n_pad * n_pad * d,
            transcendentals=0,
            bytes_accessed=(2 * n_pad * d + n_pad * n_pad) * 4),
    )(z, z)

    if n_pad != n:
        out = out[:n, :n]
    return out


if __name__ == "__main__":
    # Small latent matrix z: 16 nodes x 8 latent features.
    N, D = 16, 8
    key = jax.random.PRNGKey(0)
    z = jax.random.normal(key, (N, D), jnp.float32)

    adj = jax.jit(inner_product_decoder)(z)
    jax.block_until_ready(adj)

    assert adj.shape == (N, N)
    ref = z @ z.T                       # reference: identity activation
    assert jnp.allclose(adj, ref, atol=1e-5, rtol=1e-5)
    # Symmetry sanity check of the inner-product decoder.
    assert jnp.allclose(adj, adj.T, atol=1e-5)

    print("KERNEL_OK")
</pallas_src>

<mosaic_0001>
module attributes {stable_mosaic.version = 11 : i64} {
  func.func @_inner_product_kernel(%arg0: i32, %arg1: i32, %arg2: memref<128x8xf32, #tpu.memory_space<vmem>>, %arg3: memref<128x8xf32, #tpu.memory_space<vmem>>, %arg4: memref<128x128xf32, #tpu.memory_space<vmem>>) attributes {dimension_semantics = [#tpu.dimension_semantics<parallel>, #tpu.dimension_semantics<parallel>], iteration_bounds = array<i64: 1, 1>, scalar_prefetch = 0 : i64, scratch_operands = 0 : i64, tpu.core_type = #tpu.core_type<tc>, window_params = [{transform_indices = @transform_0, window_bounds = array<i64: 128, 8>}, {transform_indices = @transform_1, window_bounds = array<i64: 128, 8>}, {transform_indices = @transform_2, window_bounds = array<i64: 128, 128>}]} {
    %c0 = arith.constant 0 : index
    %c0_0 = arith.constant 0 : index
    %0 = vector.load %arg2[%c0, %c0_0] : memref<128x8xf32, #tpu.memory_space<vmem>>, vector<128x8xf32>
    %c0_1 = arith.constant 0 : index
    %c0_2 = arith.constant 0 : index
    %1 = vector.load %arg3[%c0_1, %c0_2] : memref<128x8xf32, #tpu.memory_space<vmem>>, vector<128x8xf32>
    %cst = arith.constant dense<0.000000e+00> : vector<128x128xf32>
    %2 = tpu.matmul %0, %1, %cst {dimension_numbers = #tpu.dot_dimension_numbers<[1], [1], [0], [0], [0, 0, 1, 0], [], []>} : vector<128x8xf32>, vector<128x8xf32>, vector<128x128xf32> -> vector<128x128xf32>
    %c0_3 = arith.constant 0 : index
    %c0_4 = arith.constant 0 : index
    %3 = vector.load %arg4[%c0_3, %c0_4] : memref<128x128xf32, #tpu.memory_space<vmem>>, vector<128x128xf32>
    tpu.vector_store %arg4[%c0_3, %c0_4], %2 {strides = array<i32>} : memref<128x128xf32, #tpu.memory_space<vmem>>, vector<128x128xf32>,
    return
  }
  func.func @transform_0(%arg0: i32, %arg1: i32) -> (i32, i32) {
    %c0_i32 = arith.constant 0 : i32
    %c0_i32_0 = arith.constant 0 : i32
    return %arg0, %c0_i32 : i32, i32
  }
  func.func @transform_1(%arg0: i32, %arg1: i32) -> (i32, i32) {
    %c0_i32 = arith.constant 0 : i32
    %c0_i32_0 = arith.constant 0 : i32
    return %arg1, %c0_i32 : i32, i32
  }
  func.func @transform_2(%arg0: i32, %arg1: i32) -> (i32, i32) {
    %c0_i32 = arith.constant 0 : i32
    return %arg0, %arg1 : i32, i32
  }
}

</mosaic_0001>

<bundles_post_ra>
// kernel: inner_product_decoder.1
= control target key start
LH: loop header
LB: loop body
LE: loop exit
PB: predicated region body
PF: predicated region fallthrough
CT: control target
= control target key end

     0   :  { %vm43_vm0 = vcmask 64512   ;;  %s734_s1 = inlined_call_operand.vmem [shape: f32[128,8], index: 1, kind: input, shape index: {}, may-alias: {0,1}]   ;;  %s735_s0 = inlined_call_operand.vmem [shape: f32[128,8], index: 0, kind: input, shape index: {}, may-alias: {0,1}]   ;;  %s736_s2 = inlined_call_operand.vmem [shape: f32[128,128], index: 2, kind: output, shape index: {}]  }
   0x1   :  { %v27_v0 = vld [vmem:[%s734_s1] sm:$0xff]  ;;  %v28_v1 = vld [vmem:[%s734_s1 + $0x8] sm:$0xff]  ;;  %vm512_vm1 = vmpackc.low %vm43_vm0, %vm43_vm0 }
   0x2   :  { %v425_v3 = vpack.c.bf16 %v28_v1, %v27_v0  ;;  %v29_v4 = vld [vmem:[%s734_s1 + $0x10] sm:$0xff]  ;;  %v30_v5 = vld [vmem:[%s734_s1 + $0x18] sm:$0xff]  ;;  %v11_v7 = vld [vmem:[%s735_s0] sm:$0xff] }
   0x3   :  { %v431_v6 = vpack.c.bf16 %v30_v5, %v29_v4  ;;  %v31_v8 = vld [vmem:[%s734_s1 + $0x20] sm:$0xff]  ;;  %v32_v9 = vld [vmem:[%s734_s1 + $0x28] sm:$0xff]  ;;  %401 = vmatprep.mubr.msk.f32.mxu0 %vm43_vm0, %v11_v7  ;;  %v33_v12 = vld [vmem:[%s734_s1 + $0x30] sm:$0xff] }
   0x4   :  { %427 = vmatprep.subr.msk.bf16.mxu0 %vm512_vm1, %v425_v3  ;;  %473 = vmatprep.subr.msk.bf16.mxu1 %vm512_vm1, %v425_v3  ;;  %v19_v10 = vld [vmem:[%s735_s0 + $0x40] sm:$0xff]  ;;  %v437_v11 = vpack.c.bf16 %v32_v9, %v31_v8  ;;  %v34_v13 = vld [vmem:[%s734_s1 + $0x38] sm:$0xff]  ;;  %v36_v16 = vld [vmem:[%s734_s1 + $0x48] sm:$0xff] }
   0x5   :  { %430 = vmatpush3.bf16.xpose.msk.msra.mxu0 %vm512_vm1, %v425_v3  ;;  %481 = vmatpush3.bf16.xpose.msk.msra.mxu1 %vm512_vm1, %v425_v3  ;;  %v443_v14 = vpack.c.bf16 %v34_v13, %v33_v12  ;;  %v35_v15 = vld [vmem:[%s734_s1 + $0x40] sm:$0xff]  ;;  %v37_v18 = vld [vmem:[%s734_s1 + $0x50] sm:$0xff]  ;;  %v38_v19 = vld [vmem:[%s734_s1 + $0x58] sm:$0xff] }
   0x6   :  { %433 = vmatprep.subr.msk.bf16.mxu0 %vm512_vm1, %v431_v6  ;;  %474 = vmatprep.subr.msk.bf16.mxu1 %vm512_vm1, %v431_v6  ;;  %v449_v17 = vpack.c.bf16 %v36_v16, %v35_v15  ;;  %v455_v20 = vpack.c.bf16 %v38_v19, %v37_v18  ;;  %v39_v21 = vld [vmem:[%s734_s1 + $0x60] sm:$0xff]  ;;  %v40_v22 = vld [vmem:[%s734_s1 + $0x68] sm:$0xff]  ;;  %v41_v24 = vld [vmem:[%s734_s1 + $0x70] sm:$0xff] }
   0x7   :  { %413 = vmatprep.mubr.msk.f32.mxu1 %vm43_vm0, %v19_v10  ;;  %v461_v23 = vpack.c.bf16 %v40_v22, %v39_v21  ;;  %v42_v25 = vld [vmem:[%s734_s1 + $0x78] sm:$0xff]  ;;  %v12_v27 = vld [vmem:[%s735_s0 + $0x8] sm:$0xff]  ;;  %v13_v29 = vld [vmem:[%s735_s0 + $0x10] sm:$0xff] }
   0x8   :  { %v467_v26 = vpack.c.bf16 %v42_v25, %v41_v24  ;;  %v20_v28 = vld [vmem:[%s735_s0 + $0x48] sm:$0xff]  ;;  %v21_v30 = vld [vmem:[%s735_s0 + $0x50] sm:$0xff]  ;;  %v14_v31 = vld [vmem:[%s735_s0 + $0x18] sm:$0xff] }
   0x9   :  { %v22_v32 = vld [vmem:[%s735_s0 + $0x58] sm:$0xff]  ;;  %v15_v33 = vld [vmem:[%s735_s0 + $0x20] sm:$0xff]  ;;  %v16_v35 = vld [vmem:[%s735_s0 + $0x28] sm:$0xff] }
   0xa   :  { %v23_v34 = vld [vmem:[%s735_s0 + $0x60] sm:$0xff]  ;;  %v24_v36 = vld [vmem:[%s735_s0 + $0x68] sm:$0xff]  ;;  %v17_v37 = vld [vmem:[%s735_s0 + $0x30] sm:$0xff] }
   0xb   :  { %v25_v38 = vld [vmem:[%s735_s0 + $0x70] sm:$0xff]  ;;  %v18_v39 = vld [vmem:[%s735_s0 + $0x38] sm:$0xff] }
   0xc   :  { %v26_v40 = vld [vmem:[%s735_s0 + $0x78] sm:$0xff] }
   0xd   :  { %436 = vmatpush3.bf16.xpose.msk.msra.mxu0 %vm512_vm1, %v431_v6  ;;  %482 = vmatpush3.bf16.xpose.msk.msra.mxu1 %vm512_vm1, %v431_v6 }
   0xe   :  { %439 = vmatprep.subr.msk.bf16.mxu0 %vm512_vm1, %v437_v11  ;;  %475 = vmatprep.subr.msk.bf16.mxu1 %vm512_vm1, %v437_v11 }
  0x15   :  { %442 = vmatpush3.bf16.xpose.msk.msra.mxu0 %vm512_vm1, %v437_v11  ;;  %483 = vmatpush3.bf16.xpose.msk.msra.mxu1 %vm512_vm1, %v437_v11 }
  0x16   :  { %445 = vmatprep.subr.msk.bf16.mxu0 %vm512_vm1, %v443_v14  ;;  %476 = vmatprep.subr.msk.bf16.mxu1 %vm512_vm1, %v443_v14 }
  0x1d   :  { %448 = vmatpush3.bf16.xpose.msk.msra.mxu0 %vm512_vm1, %v443_v14  ;;  %484 = vmatpush3.bf16.xpose.msk.msra.mxu1 %vm512_vm1, %v443_v14 }
  0x1e   :  { %451 = vmatprep.subr.msk.bf16.mxu0 %vm512_vm1, %v449_v17  ;;  %477 = vmatprep.subr.msk.bf16.mxu1 %vm512_vm1, %v449_v17 }
  0x25   :  { %454 = vmatpush3.bf16.xpose.msk.msra.mxu0 %vm512_vm1, %v449_v17  ;;  %485 = vmatpush3.bf16.xpose.msk.msra.mxu1 %vm512_vm1, %v449_v17 }
  0x26   :  { %457 = vmatprep.subr.msk.bf16.mxu0 %vm512_vm1, %v455_v20  ;;  %478 = vmatprep.subr.msk.bf16.mxu1 %vm512_vm1, %v455_v20 }
  0x2d   :  { %460 = vmatpush3.bf16.xpose.msk.msra.mxu0 %vm512_vm1, %v455_v20  ;;  %486 = vmatpush3.bf16.xpose.msk.msra.mxu1 %vm512_vm1, %v455_v20 }
  0x2e   :  { %463 = vmatprep.subr.msk.bf16.mxu0 %vm512_vm1, %v461_v23  ;;  %479 = vmatprep.subr.msk.bf16.mxu1 %vm512_vm1, %v461_v23 }
  0x35   :  { %466 = vmatpush3.bf16.xpose.msk.msra.mxu0 %vm512_vm1, %v461_v23  ;;  %487 = vmatpush3.bf16.xpose.msk.msra.mxu1 %vm512_vm1, %v461_v23 }
  0x36   :  { %469 = vmatprep.subr.msk.bf16.mxu0 %vm512_vm1, %v467_v26  ;;  %480 = vmatprep.subr.msk.bf16.mxu1 %vm512_vm1, %v467_v26 }
  0x3d   :  { %472 = vmatpush3.bf16.xpose.msk.msra.mxu0 %vm512_vm1, %v467_v26  ;;  %488 = vmatpush3.bf16.xpose.msk.msra.mxu1 %vm512_vm1, %v467_v26 }
  0x44   :  { %402 = vmatmul.mubr.msk.f32.vlgmr.msra.gmra.mrb[0].mxu0 %vm43_vm0, %v12_v27  ;;  %414 = vmatmul.mubr.msk.f32.vlgmr.msra.gmra.mrb[0].mxu1 %vm43_vm0, %v20_v28 }
  0x45   :  { %404 = vmatprep.mubr.msk.f32.mxu0 %vm43_vm0, %v13_v29  ;;  %416 = vmatprep.mubr.msk.f32.mxu1 %vm43_vm0, %v21_v30 }
  0x48   :  { %405 = vmatmul.mubr.msk.f32.gmra.mrb[2].mxu0 %vm43_vm0, %v14_v31  ;;  %417 = vmatmul.mubr.msk.f32.gmra.mrb[2].mxu1 %vm43_vm0, %v22_v32 }
  0x49   :  { %407 = vmatprep.mubr.msk.f32.mxu0 %vm43_vm0, %v15_v33  ;;  %419 = vmatprep.mubr.msk.f32.mxu1 %vm43_vm0, %v23_v34 }
  0x4c   :  { %408 = vmatmul.mubr.msk.f32.gmra.mrb[4].mxu0 %vm43_vm0, %v16_v35  ;;  %420 = vmatmul.mubr.msk.f32.gmra.mrb[4].mxu1 %vm43_vm0, %v24_v36 }
  0x4d   :  { %410 = vmatprep.mubr.msk.f32.mxu0 %vm43_vm0, %v17_v37  ;;  %422 = vmatprep.mubr.msk.f32.mxu1 %vm43_vm0, %v25_v38 }
  0x50   :  { %411 = vmatmul.mubr.msk.f32.gmra.mrb[6].mxu0 %vm43_vm0, %v18_v39  ;;  %423 = vmatmul.mubr.msk.f32.gmra.mrb[6].mxu1 %vm43_vm0, %v26_v40 }
 0x117   :  { %v403_v41 = vpop.f32.mrb[0].mxu0  ;;  %v415_v42 = vpop.f32.mrb[0].mxu1 }
 0x118   :  { %286 = vst [vmem:[%s736_s2 + $0x8] sm:$0xff] %v403_v41  ;;  %294 = vst [vmem:[%s736_s2 + $0x48] sm:$0xff] %v415_v42  ;;  %v206_v43 = vpop.f32.mrb[1].mxu0  ;;  %v246_v44 = vpop.f32.mrb[1].mxu1 }
 0x119   :  { %285 = vst [vmem:[%s736_s2] sm:$0xff] %v206_v43  ;;  %293 = vst [vmem:[%s736_s2 + $0x40] sm:$0xff] %v246_v44 }
 0x11b   :  { %v406_v45 = vpop.f32.mrb[2].mxu0  ;;  %v418_v46 = vpop.f32.mrb[2].mxu1 }
 0x11c   :  { %288 = vst [vmem:[%s736_s2 + $0x18] sm:$0xff] %v406_v45  ;;  %296 = vst [vmem:[%s736_s2 + $0x58] sm:$0xff] %v418_v46  ;;  %v216_v47 = vpop.f32.mrb[3].mxu0  ;;  %v256_v48 = vpop.f32.mrb[3].mxu1 }
 0x11d   :  { %287 = vst [vmem:[%s736_s2 + $0x10] sm:$0xff] %v216_v47  ;;  %295 = vst [vmem:[%s736_s2 + $0x50] sm:$0xff] %v256_v48 }
 0x11f   :  { %v409_v49 = vpop.f32.mrb[4].mxu0  ;;  %v421_v50 = vpop.f32.mrb[4].mxu1 }
 0x120   :  { %290 = vst [vmem:[%s736_s2 + $0x28] sm:$0xff] %v409_v49  ;;  %298 = vst [vmem:[%s736_s2 + $0x68] sm:$0xff] %v421_v50  ;;  %v226_v51 = vpop.f32.mrb[5].mxu0  ;;  %v266_v52 = vpop.f32.mrb[5].mxu1 }
 0x121   :  { %289 = vst [vmem:[%s736_s2 + $0x20] sm:$0xff] %v226_v51  ;;  %297 = vst [vmem:[%s736_s2 + $0x60] sm:$0xff] %v266_v52 }
 0x123   :  { %v412_v53 = vpop.f32.mrb[6].mxu0  ;;  %v424_v54 = vpop.f32.mrb[6].mxu1 }
 0x124   :  { %292 = vst [vmem:[%s736_s2 + $0x38] sm:$0xff] %v412_v53  ;;  %300 = vst [vmem:[%s736_s2 + $0x78] sm:$0xff] %v424_v54  ;;  %v236_v55 = vpop.f32.mrb[7].mxu0  ;;  %v276_v56 = vpop.f32.mrb[7].mxu1 }
 0x125   :  { %291 = vst [vmem:[%s736_s2 + $0x30] sm:$0xff] %v236_v55  ;;  %299 = vst [vmem:[%s736_s2 + $0x70] sm:$0xff] %v276_v56 }

</bundles_post_ra>
